<compile_context>
chip_gen: v7x
topology: tpu7x:2x2x1
jax: 0.10.0
libtpu: 0.0.40
codegen_flags: <defaults>
</compile_context>

<pallas_src>
import math
from functools import partial

import jax
import jax.numpy as jnp
from jax import lax
from jax.experimental import pallas as pl
from jax.experimental.pallas import tpu as pltpu

LANE = 128
SUB = 8
TM_MAX = 2048    # max rows per grid step (fits v5e's 16 MiB default scoped VMEM with headroom)
TM_SPLIT = 1024  # split into >=2 grid steps once each step would still get >= this many rows


def _round_up(x, m):
    return (x + m - 1) // m * m


def _cdiv(a, b):
    return -(-a // b)


def _pad2d(a, rows, cols):
    r, c = a.shape
    return jnp.pad(a, ((0, rows - r), (0, cols - c)))


def mlp_kernel(x_ref, w1_ref, b1_ref, w2_ref, b2_ref, w3t_ref, b3t_ref, ot_ref):
    # Layer 1: Linear + ReLU. bf16 matmul on the MXU, f32 accumulate / epilogue
    # (f32 epilogue is safe on v5e, which has no bf16 VALU).
    x = x_ref[...].astype(jnp.bfloat16)
    h1 = jnp.dot(x, w1_ref[...], preferred_element_type=jnp.float32)
    h1 = jnp.maximum(h1 + b1_ref[...], 0.0)
    # Layer 2: Linear + ReLU
    h2 = jnp.dot(h1.astype(jnp.bfloat16), w2_ref[...],
                 preferred_element_type=jnp.float32)
    h2 = jnp.maximum(h2 + b2_ref[...], 0.0)
    # Layer 3 (transposed): out_t[o, m] = sum_k w3t[o, k] * h2[m, k]
    # Keeps the batch on the lane axis of the output -> small, lane-dense HBM store.
    out_t = lax.dot_general(
        w3t_ref[...], h2.astype(jnp.bfloat16),
        dimension_numbers=(((1,), (1,)), ((), ())),
        preferred_element_type=jnp.float32)
    ot_ref[...] = (out_t + b3t_ref[...]).astype(ot_ref.dtype)


def prepare_params(params):
    """One-time host-side prep.

    Pads the hidden dim to a multiple of 128 (lane-dense MXU tiles) and the output dim to a
    multiple of 8 (f32 sublane tile), casts weights to bf16, and stores w3/b3 transposed so
    layer 3 can be produced batch-on-lanes. Zero padding is mathematically inert: padded
    hidden columns have zero weights and zero bias, stay 0 through ReLU, and feed zero rows
    of the next layer; padded output rows are sliced off in the wrapper.
    """
    w1, b1, w2, b2, w3, b3 = (params[k] for k in ("w1", "b1", "w2", "b2", "w3", "b3"))
    in_dim, hidden = w1.shape
    out_dim = w3.shape[1]
    hid_p = _round_up(hidden, LANE)
    out_p = _round_up(out_dim, SUB)
    weights = (
        _pad2d(w1, in_dim, hid_p).astype(jnp.bfloat16),    # [in_dim, hid_p]
        _pad2d(b1, 1, hid_p).astype(jnp.float32),          # [1, hid_p]
        _pad2d(w2, hid_p, hid_p).astype(jnp.bfloat16),     # [hid_p, hid_p]
        _pad2d(b2, 1, hid_p).astype(jnp.float32),          # [1, hid_p]
        _pad2d(w3, hid_p, out_p).T.astype(jnp.bfloat16),   # [out_p, hid_p]  (w3^T)
        _pad2d(b3, 1, out_p).T.astype(jnp.float32),        # [out_p, 1]      (b3^T)
    )
    return {"weights": weights, "in_dim": in_dim, "out_dim": out_dim}


@partial(jax.jit, static_argnames=("out_dim",))
def _mlp_forward(x, weights, *, out_dim):
    w1, b1, w2, b2, w3t, b3t = weights
    B, in_dim = x.shape
    assert in_dim == w1.shape[0], (in_dim, w1.shape)
    hid_p = w1.shape[1]
    out_p = w3t.shape[0]

    # --- batch tiling --------------------------------------------------------------------
    # Big tiles amortize the per-grid-step pipeline overhead; the tile is chosen to minimize
    # batch padding (never ~2x), and medium/large batches get >= 2 grid steps so v7x's two
    # TensorCores both see work via the "parallel" dimension semantics.
    nb = _cdiv(B, TM_MAX)
    if nb == 1 and B >= 2 * TM_SPLIT:
        nb = 2
    if nb > 1:
        # multiple of 128 keeps the transposed output's lane-dim blocks legal & dense
        tm = _round_up(_cdiv(B, nb), LANE)
    else:
        tm = _round_up(max(B, 1), SUB)
    nb = _cdiv(B, tm)
    b_total = nb * tm
    if b_total != B:
        x = jnp.pad(x, ((0, b_total - B), (0, 0)))  # batch-only pad, less than one tile of rows

    flops = 2 * B * (in_dim * hid_p + hid_p * hid_p + hid_p * out_p)
    bytes_accessed = (
        b_total * in_dim * 4
        + (w1.size + w2.size + w3t.size) * 2
        + (b1.size + b2.size + b3t.size) * 4
        + out_p * b_total * 4
    )

    def resident(a):  # weights/biases: same block every step -> stay resident in VMEM
        return pl.BlockSpec(a.shape, lambda i: (0, 0))

    out_t = pl.pallas_call(
        mlp_kernel,
        out_shape=jax.ShapeDtypeStruct((out_p, b_total), jnp.float32),
        grid=(nb,),
        in_specs=[
            pl.BlockSpec((tm, in_dim), lambda i: (i, 0)),
            resident(w1), resident(b1),
            resident(w2), resident(b2),
            resident(w3t), resident(b3t),
        ],
        out_specs=pl.BlockSpec((out_p, tm), lambda i: (0, i)),
        compiler_params=pltpu.CompilerParams(
            dimension_semantics=("parallel",),  # batch steps shard across v7x's 2 TCs
        ),
        cost_estimate=pl.CostEstimate(
            flops=flops, transcendentals=0, bytes_accessed=bytes_accessed),
    )(x, w1, b1, w2, b2, w3t, b3t)

    # [out_dim, B] -> [B, out_dim]; tiny XLA transpose, fused under jit.
    return out_t[:out_dim, :B].T


def mlp_forward(x, prepped):
    """x: [B, in_dim] float32. prepped: output of prepare_params()."""
    return _mlp_forward(x, prepped["weights"], out_dim=prepped["out_dim"])


def xavier_uniform(key, fan_in, fan_out, gain):
    # torch.nn.init.xavier_uniform_ with gain: U(-a, a), a = gain*sqrt(6/(fan_in+fan_out))
    a = gain * math.sqrt(6.0 / (fan_in + fan_out))
    # Stored as [in, out] (transpose of PyTorch layout); distribution is symmetric.
    return jax.random.uniform(key, (fan_in, fan_out), jnp.float32, minval=-a, maxval=a)


def init_params(key, in_dim, hidden_dim, out_dim):
    gain = math.sqrt(2.0)  # nn.init.calculate_gain('relu')
    k1, k2, k3 = jax.random.split(key, 3)
    return {
        "w1": xavier_uniform(k1, in_dim, hidden_dim, gain),
        "b1": jnp.full((1, hidden_dim), 0.01, jnp.float32),
        "w2": xavier_uniform(k2, hidden_dim, hidden_dim, gain),
        "b2": jnp.full((1, hidden_dim), 0.01, jnp.float32),
        "w3": xavier_uniform(k3, hidden_dim, out_dim, gain),
        "b3": jnp.full((1, out_dim), 0.01, jnp.float32),
    }


if __name__ == "__main__":
    key = jax.random.PRNGKey(0)
    k_x, k_p = jax.random.split(key)

    batch, in_dim, hidden_dim, out_dim = 8, 32, 64, 16
    x = jax.random.normal(k_x, (batch, in_dim), jnp.float32)
    params = init_params(k_p, in_dim, hidden_dim, out_dim)
    prepped = prepare_params(params)

    out = mlp_forward(x, prepped)
    jax.block_until_ready(out)

    # Reference check in plain f32 JAX (same math as the PyTorch module).
    ref = jnp.maximum(x @ params["w1"] + params["b1"], 0.0)
    ref = jnp.maximum(ref @ params["w2"] + params["b2"], 0.0)
    ref = ref @ params["w3"] + params["b3"]
    assert out.shape == (batch, out_dim)
    # Tolerance loosened for bf16 inputs/weights vs. the f32 reference.
    assert jnp.allclose(out, ref, atol=1e-1, rtol=5e-2), float(jnp.max(jnp.abs(out - ref)))

    print("KERNEL_OK")
</pallas_src>

<mosaic_0001>
module attributes {stable_mosaic.version = 11 : i64} {
  func.func @mlp_kernel(%arg0: i32, %arg1: memref<8x32xf32, #tpu.memory_space<vmem>>, %arg2: memref<32x128xbf16, #tpu.memory_space<vmem>>, %arg3: memref<1x128xf32, #tpu.memory_space<vmem>>, %arg4: memref<128x128xbf16, #tpu.memory_space<vmem>>, %arg5: memref<1x128xf32, #tpu.memory_space<vmem>>, %arg6: memref<16x128xbf16, #tpu.memory_space<vmem>>, %arg7: memref<16x1xf32, #tpu.memory_space<vmem>>, %arg8: memref<16x8xf32, #tpu.memory_space<vmem>>) attributes {dimension_semantics = [#tpu.dimension_semantics<parallel>], iteration_bounds = array<i64: 1>, scalar_prefetch = 0 : i64, scratch_operands = 0 : i64, tpu.core_type = #tpu.core_type<tc>, window_params = [{transform_indices = @transform_0, window_bounds = array<i64: 8, 32>}, {pipeline_mode = #tpu.pipeline_mode<synchronous>, transform_indices = @transform_1, window_bounds = array<i64: 32, 128>}, {pipeline_mode = #tpu.pipeline_mode<synchronous>, transform_indices = @transform_2, window_bounds = array<i64: 1, 128>}, {pipeline_mode = #tpu.pipeline_mode<synchronous>, transform_indices = @transform_3, window_bounds = array<i64: 128, 128>}, {pipeline_mode = #tpu.pipeline_mode<synchronous>, transform_indices = @transform_4, window_bounds = array<i64: 1, 128>}, {pipeline_mode = #tpu.pipeline_mode<synchronous>, transform_indices = @transform_5, window_bounds = array<i64: 16, 128>}, {pipeline_mode = #tpu.pipeline_mode<synchronous>, transform_indices = @transform_6, window_bounds = array<i64: 16, 1>}, {transform_indices = @transform_7, window_bounds = array<i64: 16, 8>}]} {
    %c0 = arith.constant 0 : index
    %c0_0 = arith.constant 0 : index
    %0 = vector.load %arg1[%c0, %c0_0] : memref<8x32xf32, #tpu.memory_space<vmem>>, vector<8x32xf32>
    %1 = arith.truncf %0 : vector<8x32xf32> to vector<8x32xbf16>
    %c0_1 = arith.constant 0 : index
    %c0_2 = arith.constant 0 : index
    %2 = vector.load %arg2[%c0_1, %c0_2] : memref<32x128xbf16, #tpu.memory_space<vmem>>, vector<32x128xbf16>
    %cst = arith.constant dense<0.000000e+00> : vector<8x128xf32>
    %3 = tpu.matmul %1, %2, %cst {dimension_numbers = #tpu.dot_dimension_numbers<[1], [0], [0], [1], [0, 0, 1, 1], [], []>} : vector<8x32xbf16>, vector<32x128xbf16>, vector<8x128xf32> -> vector<8x128xf32>
    %c0_3 = arith.constant 0 : index
    %c0_4 = arith.constant 0 : index
    %4 = vector.load %arg3[%c0_3, %c0_4] : memref<1x128xf32, #tpu.memory_space<vmem>>, vector<1x128xf32>
    %5 = vector.broadcast %4 : vector<1x128xf32> to vector<8x128xf32>
    %6 = arith.addf %3, %5 : vector<8x128xf32>
    %cst_5 = arith.constant 0.000000e+00 : f32
    %7 = vector.broadcast %cst_5 : f32 to vector<8x128xf32>
    %8 = arith.maximumf %6, %7 : vector<8x128xf32>
    %9 = arith.truncf %8 : vector<8x128xf32> to vector<8x128xbf16>
    %c0_6 = arith.constant 0 : index
    %c0_7 = arith.constant 0 : index
    %10 = vector.load %arg4[%c0_6, %c0_7] : memref<128x128xbf16, #tpu.memory_space<vmem>>, vector<128x128xbf16>
    %cst_8 = arith.constant dense<0.000000e+00> : vector<8x128xf32>
    %11 = tpu.matmul %9, %10, %cst_8 {dimension_numbers = #tpu.dot_dimension_numbers<[1], [0], [0], [1], [0, 0, 1, 1], [], []>} : vector<8x128xbf16>, vector<128x128xbf16>, vector<8x128xf32> -> vector<8x128xf32>
    %c0_9 = arith.constant 0 : index
    %c0_10 = arith.constant 0 : index
    %12 = vector.load %arg5[%c0_9, %c0_10] : memref<1x128xf32, #tpu.memory_space<vmem>>, vector<1x128xf32>
    %13 = vector.broadcast %12 : vector<1x128xf32> to vector<8x128xf32>
    %14 = arith.addf %11, %13 : vector<8x128xf32>
    %cst_11 = arith.constant 0.000000e+00 : f32
    %15 = vector.broadcast %cst_11 : f32 to vector<8x128xf32>
    %16 = arith.maximumf %14, %15 : vector<8x128xf32>
    %c0_12 = arith.constant 0 : index
    %c0_13 = arith.constant 0 : index
    %17 = vector.load %arg6[%c0_12, %c0_13] : memref<16x128xbf16, #tpu.memory_space<vmem>>, vector<16x128xbf16>
    %18 = arith.truncf %16 : vector<8x128xf32> to vector<8x128xbf16>
    %cst_14 = arith.constant dense<0.000000e+00> : vector<16x8xf32>
    %19 = tpu.matmul %17, %18, %cst_14 {dimension_numbers = #tpu.dot_dimension_numbers<[1], [1], [0], [0], [0, 0, 1, 0], [], []>} : vector<16x128xbf16>, vector<8x128xbf16>, vector<16x8xf32> -> vector<16x8xf32>
    %c0_15 = arith.constant 0 : index
    %c0_16 = arith.constant 0 : index
    %20 = vector.load %arg7[%c0_15, %c0_16] : memref<16x1xf32, #tpu.memory_space<vmem>>, vector<16x1xf32>
    %21 = vector.broadcast %20 : vector<16x1xf32> to vector<16x8xf32>
    %22 = arith.addf %19, %21 : vector<16x8xf32>
    %c0_17 = arith.constant 0 : index
    %c0_18 = arith.constant 0 : index
    %23 = vector.load %arg8[%c0_17, %c0_18] : memref<16x8xf32, #tpu.memory_space<vmem>>, vector<16x8xf32>
    tpu.vector_store %arg8[%c0_17, %c0_18], %22 {strides = array<i32>} : memref<16x8xf32, #tpu.memory_space<vmem>>, vector<16x8xf32>,
    return
  }
  func.func @transform_0(%arg0: i32) -> (i32, i32) {
    %c0_i32 = arith.constant 0 : i32
    %c0_i32_0 = arith.constant 0 : i32
    return %arg0, %c0_i32 : i32, i32
  }
  func.func @transform_1(%arg0: i32) -> (i32, i32) {
    %c0_i32 = arith.constant 0 : i32
    %c0_i32_0 = arith.constant 0 : i32
    %c0_i32_1 = arith.constant 0 : i32
    return %c0_i32, %c0_i32_0 : i32, i32
  }
  func.func @transform_2(%arg0: i32) -> (i32, i32) {
    %c0_i32 = arith.constant 0 : i32
    %c0_i32_0 = arith.constant 0 : i32
    %c0_i32_1 = arith.constant 0 : i32
    return %c0_i32, %c0_i32_0 : i32, i32
  }
  func.func @transform_3(%arg0: i32) -> (i32, i32) {
    %c0_i32 = arith.constant 0 : i32
    %c0_i32_0 = arith.constant 0 : i32
    %c0_i32_1 = arith.constant 0 : i32
    return %c0_i32, %c0_i32_0 : i32, i32
  }
  func.func @transform_4(%arg0: i32) -> (i32, i32) {
    %c0_i32 = arith.constant 0 : i32
    %c0_i32_0 = arith.constant 0 : i32
    %c0_i32_1 = arith.constant 0 : i32
    return %c0_i32, %c0_i32_0 : i32, i32
  }
  func.func @transform_5(%arg0: i32) -> (i32, i32) {
    %c0_i32 = arith.constant 0 : i32
    %c0_i32_0 = arith.constant 0 : i32
    %c0_i32_1 = arith.constant 0 : i32
    return %c0_i32, %c0_i32_0 : i32, i32
  }
  func.func @transform_6(%arg0: i32) -> (i32, i32) {
    %c0_i32 = arith.constant 0 : i32
    %c0_i32_0 = arith.constant 0 : i32
    %c0_i32_1 = arith.constant 0 : i32
    return %c0_i32, %c0_i32_0 : i32, i32
  }
  func.func @transform_7(%arg0: i32) -> (i32, i32) {
    %c0_i32 = arith.constant 0 : i32
    %c0_i32_0 = arith.constant 0 : i32
    return %c0_i32, %arg0 : i32, i32
  }
}

</mosaic_0001>

<bundles_post_ra>
// kernel: _mlp_forward.1
= control target key start
LH: loop header
LB: loop body
LE: loop exit
PB: predicated region body
PF: predicated region fallthrough
CT: control target
= control target key end

     0   :  { %12 = vsyncpa [#allocation3], 0  ;;  %s581_s0 = inlined_call_operand.hbm [shape: f32[8,32], index: 0, kind: input, shape index: {}]   ;;  %s582_s1 = inlined_call_operand.vmem [shape: bf16[32,128], index: 1, kind: input, shape index: {}]   ;;  %s583_s2 = inlined_call_operand.hbm [shape: f32[1,128], index: 2, kind: input, shape index: {}]   ;;  %s584_s3 = inlined_call_operand.hbm [shape: bf16[128,128], index: 3, kind: input, shape index: {}]   ;;  %s585_s4 = inlined_call_operand.vmem [shape: f32[1,128], index: 4, kind: input, shape index: {}]   ;;  %s586_s5 = inlined_call_operand.vmem [shape: bf16[16,128], index: 5, kind: input, shape index: {}]   ;;  %s587_s6 = inlined_call_operand.vmem [shape: f32[16,1], index: 6, kind: input, shape index: {}]   ;;  %s588_s7 = inlined_call_operand.vmem [shape: f32[16,8], index: 7, kind: output, shape index: {}]  }
   0x1   :  { %13 = vsyncpa [#allocation5], 0  ;;  %s470_s24 = smov [#allocation4]   ;;  %s471_s26 = smov [#allocation2]  }
   0x2   :  { %s32_s25 = sshll.u32 %s470_s24, 4  ;;  %s20_s27 = sshll.u32 %s471_s26, 4  ;;  %s33_s25 = int_to_ptr.vmem [resolvable:$true] %s32_s25  ;;  %s21_s27 = int_to_ptr.vmem [resolvable:$true] %s20_s27 }
   0x3   :  { %s400_s30 = scalar_lea.hbm %s583_s2, 16 }
   0x4   :  { %p401_p0 = scmp.ne.s32.totalorder %s583_s2, %s400_s30  ;;  %p404_p1 = scmp.lt.u32.totalorder %s400_s30, %s583_s2 }
   0x6   :  { %p406_p2 = pnand %p404_p1, %p401_p0 }
   0x8   :  { %409 = shalt.err (!%p406_p2)
}
   0x9   :  { %s410_s12 = scalar_lea.vmem %s33_s25, 16  ;;  %s414_s13 = scalar_lea.vmem %s33_s25, 32 }
   0xa   :  { %p411_p3 = scmp.ne.s32.totalorder %s33_s25, %s410_s12  ;;  %p415_p4 = scmp.lt.s32.totalorder %s33_s25, %s33_s25 }
   0xb   :  { %p416_p5 = scmp.lt.s32.totalorder %s414_s13, %s410_s12 }
   0xd   :  { %p417_p6 = por %p416_p5, %p415_p4 }
   0xf   :  { %p418_p7 = pnand %p417_p6, %p411_p3 }
  0x11   :  { %421 = shalt.err (!%p418_p7)
}
  0x12   :  { %35 = dma.hbm_to_vmem [thread:$0]  %s583_s2, 16, %s33_s25, [#allocation5]  }
  0x13   :  { %s422_s18 = scalar_lea.hbm %s581_s0, 128 }
  0x14   :  { %p423_p8 = scmp.ne.s32.totalorder %s581_s0, %s422_s18  ;;  %p426_p9 = scmp.lt.u32.totalorder %s422_s18, %s581_s0 }
  0x16   :  { %p428_p10 = pnand %p426_p9, %p423_p8 }
  0x18   :  { %431 = shalt.err (!%p428_p10)
}
  0x19   :  { %s432_s23 = scalar_lea.vmem %s21_s27, 128  ;;  %p437_p12 = scmp.lt.s32.totalorder %s21_s27, %s21_s27 }
  0x1a   :  { %p433_p11 = scmp.ne.s32.totalorder %s21_s27, %s432_s23  ;;  %p438_p13 = scmp.lt.s32.totalorder %s432_s23, %s432_s23 }
  0x1c   :  { %p439_p0 = por %p438_p13, %p437_p12 }
  0x1e   :  { %p440_p1 = pnand %p439_p0, %p433_p11 }
  0x20   :  { %443 = shalt.err (!%p440_p1)
}
  0x21   :  { %23 = dma.hbm_to_vmem [thread:$0]  %s581_s0, 128, %s21_s27, [#allocation3]  }
  0x22   :  { %s472_s25 = smov [#allocation6]   ;;  %s444_s30 = scalar_lea.hbm %s584_s3, 1024 }
  0x23   :  { %s41_s26 = sshll.u32 %s472_s25, 4  ;;  %p445_p2 = scmp.ne.s32.totalorder %s584_s3, %s444_s30  ;;  %s42_s26 = int_to_ptr.vmem [resolvable:$true] %s41_s26 }
  0x24   :  { %p448_p3 = scmp.lt.u32.totalorder %s444_s30, %s584_s3 }
  0x26   :  { %p450_p4 = pnand %p448_p3, %p445_p2 }
  0x28   :  { %453 = shalt.err (!%p450_p4)
}
  0x29   :  { %s454_s12 = scalar_lea.vmem %s42_s26, 1024  ;;  %p459_p6 = scmp.lt.s32.totalorder %s42_s26, %s42_s26 }
  0x2a   :  { %p455_p5 = scmp.ne.s32.totalorder %s42_s26, %s454_s12  ;;  %p460_p7 = scmp.lt.s32.totalorder %s454_s12, %s454_s12 }
  0x2c   :  { %p461_p8 = por %p460_p7, %p459_p6 }
  0x2e   :  { %p462_p9 = pnand %p461_p8, %p455_p5 }
  0x30   :  { %465 = shalt.err (!%p462_p9)
}
  0x31   :  { %s473_s0 = smov 64   ;;  %s474_s27 = smov 4  }
  0x32   :  { %47 = dma.hbm_to_vmem [thread:$0]  %s584_s3, 1024, %s42_s26, [#allocation5], %s473_s0, %s473_s0, %s474_s27  }
  0x33   :  { %466 = dma.done.wait [#allocation3], 128  }
  0x34   :  { %467 = vsyncadd [#allocation3], 4294967168 }
  0x35   :  { %468 = dma.done.wait [#allocation5], 1040  }
  0x36   :  { %469 = vsyncadd [#allocation5], 4294966256  ;;  %v475_v0 = vmov 0.0   ;;  %vm476_vm0 = vmmov 0   ;;  %v389_v1 = vld [vmem:[%s582_s1] sm:$0xff]   ;;  %v390_v2 = vld [vmem:[%s582_s1 + $0x8] sm:$0xff]  }
  0x37   :  { %346 = vmatprep.subr.bf16.mxu0 %v475_v0  ;;  %350 = vmatprep.mubr.msk.bf16.mxu0 %vm476_vm0, %v475_v0  ;;  %v64_v3 = vld [vmem:[#allocation2] sm:$0xff]  ;;  %v391_v4 = vld [vmem:[#allocation6] sm:$0xff]   ;;  %v392_v6 = vld [vmem:[#allocation6 + $0x8] sm:$0xff]   ;;  %vm89_vm1 = vcmask 261120   ;;  %v477_v22 = vmov 0   ;;  %vm309_vm2 = vcmask 64512  }
  0x38   :  { %354 = vmatprep.subr.bf16.mxu1 %v475_v0  ;;  %370 = vmatprep.mubr.msk.bf16.mxu1 %vm476_vm0, %v475_v0  ;;  %v65_v5 = vpack.c.bf16 %v64_v3, %v64_v3  ;;  %v393_v7 = vld [vmem:[#allocation6 + $0x10] sm:$0xff]   ;;  %v394_v8 = vld [vmem:[#allocation6 + $0x18] sm:$0xff]   ;;  %v395_v9 = vld [vmem:[#allocation6 + $0x20] sm:$0xff]  }
  0x39   :  { %347 = vmatpush3.bf16.msra.mxu0 %v389_v1  ;;  %355 = vmatpush3.bf16.msra.mxu1 %v391_v4  ;;  %v396_v10 = vld [vmem:[#allocation6 + $0x28] sm:$0xff]   ;;  %v397_v11 = vld [vmem:[#allocation6 + $0x30] sm:$0xff]   ;;  %v398_v12 = vld [vmem:[#allocation6 + $0x38] sm:$0xff]  }
  0x3a   :  { %348 = vmatprep.subr.bf16.mxu0 %v475_v0  ;;  %356 = vmatprep.subr.bf16.mxu1 %v475_v0  ;;  %v318_v13 = vld [vmem:[#allocation4] ss:$0 sm:$0xff]  ;;  %v250_v21 = vld [vmem:[%s587_s6] sm:$0xff] }
  0x3b   :  { %388 = vset.pattern.permute.xlu0 %v477_v22  ;;  %v251_v23 = vld [vmem:[%s587_s6 + $0x8] sm:$0xff]  ;;  %v322_v24 = vld [vmem:[%s585_s4] ss:$0 sm:$0xff] }
  0x3c   :  { %254 = vperm.xlu0 %388, %v250_v21   ;;  %v399_v32 = vld [vmem:[%s586_s5] sm:$0xff]  }
  0x3d   :  { %349 = vmatpush3.bf16.msra.mxu0 %v390_v2  ;;  %357 = vmatpush3.bf16.msra.mxu1 %v392_v6 }
  0x3e   :  { %374 = vmatprep.subr.bf16.mxu0 %v475_v0  ;;  %358 = vmatprep.subr.bf16.mxu1 %v475_v0 }
  0x40   :  { %351 = vmatmul.mubr.msk.bf16.vlgmr.msra.gmra.mrb[0].mxu0 %vm89_vm1, %v65_v5  ;;  %259 = vperm.xlu0 %388, %v251_v23  }
  0x41   :  { %376 = vmatprep.mubr.msk.bf16.mxu0 %vm476_vm0, %v475_v0  ;;  %359 = vmatpush3.bf16.msra.mxu1 %v393_v7 }
  0x42   :  { %360 = vmatprep.subr.bf16.mxu1 %v475_v0 }
  0x45   :  { %361 = vmatpush3.bf16.msra.mxu1 %v394_v8 }
  0x46   :  { %362 = vmatprep.subr.bf16.mxu1 %v475_v0 }
  0x49   :  { %363 = vmatpush3.bf16.msra.mxu1 %v395_v9 }
  0x4a   :  { %364 = vmatprep.subr.bf16.mxu1 %v475_v0 }
  0x4d   :  { %365 = vmatpush3.bf16.msra.mxu1 %v396_v10 }
  0x4e   :  { %366 = vmatprep.subr.bf16.mxu1 %v475_v0 }
  0x51   :  { %367 = vmatpush3.bf16.msra.mxu1 %v397_v11 }
  0x52   :  { %368 = vmatprep.subr.bf16.mxu1 %v475_v0 }
  0x55   :  { %369 = vmatpush3.bf16.msra.mxu1 %v398_v12 }
  0xbb   :  { %v255_v33 = vpop.permute.xlu0 %254 }
  0xbf   :  { %v260_v37 = vpop.permute.xlu0 %259 }
 0x113   :  { %v127_v14 = vpop.f32.mrb[0].mxu0 }
 0x114   :  { %v128_v15 = vadd.f32 %v318_v13, %v127_v14  ;;  %v352_v16 = vpop.f32.mrb[1].mxu0 }
 0x115   :  { %v130_v17 = vpop.f32.mrb[2].mxu0 }
 0x116   :  { %v133_v18 = vmax.f32 %v128_v15, 0.0  ;;  %v353_v19 = vpop.f32.mrb[3].mxu0 }
 0x118   :  { %v134_v20 = vpack.c.bf16 %v133_v18, %v133_v18 }
 0x11a   :  { %371 = vmatmul.mubr.bf16.vlgmr.msra.gmra.mrb[0].mxu1 %v134_v20 }
 0x1ed   :  { %v240_v25 = vpop.f32.mrb[0].mxu1 }
 0x1ee   :  { %v241_v26 = vadd.f32 %v322_v24, %v240_v25  ;;  %v372_v27 = vpop.f32.mrb[1].mxu1 }
 0x1ef   :  { %v243_v28 = vpop.f32.mrb[2].mxu1 }
 0x1f0   :  { %v246_v29 = vmax.f32 %v241_v26, 0.0  ;;  %v373_v30 = vpop.f32.mrb[3].mxu1 }
 0x1f2   :  { %v249_v31 = vpack.c.bf16 %v246_v29, %v246_v29 }
 0x1f4   :  { %375 = vmatpush3.bf16.xpose.msra.mxu0 %v249_v31 }
 0x1fb   :  { %377 = vmatmul.mubr.bf16.vlgmr.msra.gmra.mrb[4].mxu0 %v399_v32 }
 0x2ce   :  { %v302_v34 = vpop.f32.mrb[4].mxu0 }
 0x2cf   :  { %v303_v35 = vadd.f32 %v302_v34, %v255_v33  ;;  %v378_v36 = vpop.f32.mrb[5].mxu0 }
 0x2d0   :  { %v305_v38 = vpop.f32.mrb[6].mxu0 }
 0x2d1   :  { %310 = vst.msk [vmem:[%s588_s7] sm:$0xff] %vm309_vm2, %v303_v35  ;;  %v306_v39 = vadd.f32 %v305_v38, %v260_v37  ;;  %v379_v40 = vpop.f32.mrb[7].mxu0 }
 0x2d3   :  { %311 = vst.msk [vmem:[%s588_s7 + $0x8] sm:$0xff] %vm309_vm2, %v306_v39 }
 0x2d4   :  { %316 = vsyncpa [#allocation3], 1 }
 0x2d5   :  { %317 = vsyncpa [#allocation5], 1 }

</bundles_post_ra>
